<compile_context>
chip_gen: v5e
topology: v5e:2x2
jax: 0.10.0
libtpu: 0.0.40
codegen_flags: <defaults>
</compile_context>

<pallas_src>
import jax
import jax.numpy as jnp
from jax.experimental import pallas as pl
from jax.experimental.pallas import tpu as pltpu


def winenet_kernel(x_ref, w1_ref, b1_ref, w2_ref, b2_ref, w3_ref, b3_ref,
                   w4t_ref, b4_ref, o_ref):
    x = x_ref[...]                                                   # [11, TB]

    h = jnp.dot(w1_ref[...], x, preferred_element_type=jnp.float32) + b1_ref[...]
    h = jnp.maximum(h, 0.0)                                          # [16, TB]

    h = jnp.dot(w2_ref[...], h, preferred_element_type=jnp.float32) + b2_ref[...]
    h = jnp.maximum(h, 0.0)                                          # [32, TB]

    h = jnp.dot(w3_ref[...], h, preferred_element_type=jnp.float32) + b3_ref[...]
    h = jnp.maximum(h, 0.0)                                          # [32, TB]

    # Final 32 -> 1 layer: a 1-row matmul wastes the MXU N dimension; do it as
    # a VPU elementwise multiply + XLU sublane reduction instead (free slots).
    out = jnp.sum(w4t_ref[...] * h, axis=0, keepdims=True) + b4_ref[...]
    o_ref[...] = out.astype(o_ref.dtype)                             # [1, TB] lane-dense


def winenet_forward(x, params, *, tile_b=2048):
    """x: [B, 11] float32.  params: dict name -> (w [out, in], b [out, 1])."""
    B, f_in = x.shape
    w1, b1 = params["input"]
    w2, b2 = params["fc1"]
    w3, b3 = params["fc2"]
    w4, b4 = params["output"]

    # Lane-aligned batch tile (multiple of 128); small batches collapse to one tile.
    tile_b = max(128, min(tile_b, pl.cdiv(B, 128) * 128))
    grid_b = pl.cdiv(B, tile_b)
    b_pad = grid_b * tile_b

    # Feature-major + batch padding, done once on the wrapper side.
    x_fm = jnp.pad(x.T, ((0, 0), (0, b_pad - B)))                    # [11, B_pad]

    def const(shape):
        # Full-array (weight/bias) block, resident across the whole grid.
        return pl.BlockSpec(shape, lambda i: (0, 0))

    flops = 2 * (11 * 16 + 16 * 32 + 32 * 32 + 32 * 1) * b_pad
    bytes_accessed = (f_in + 1) * 4 * b_pad                          # x in + y out (weights negligible)

    out_fm = pl.pallas_call(
        winenet_kernel,
        out_shape=jax.ShapeDtypeStruct((1, b_pad), jnp.float32),
        grid=(grid_b,),
        in_specs=[
            pl.BlockSpec((f_in, tile_b), lambda i: (0, i)),          # x tile, batch on lanes
            const(w1.shape), const(b1.shape),
            const(w2.shape), const(b2.shape),
            const(w3.shape), const(b3.shape),
            const((w4.shape[1], w4.shape[0])),                       # w4 passed pre-transposed: [32, 1]
            const(b4.shape),
        ],
        out_specs=pl.BlockSpec((1, tile_b), lambda i: (0, i)),
        compiler_params=pltpu.CompilerParams(
            dimension_semantics=("parallel",),                       # megacore split on v7x
            vmem_limit_bytes=16 * 1024 * 1024,                       # >> 2x(x tile + out tile + weights); safe on v5e/v6e/v7x
        ),
        cost_estimate=pl.CostEstimate(
            flops=flops, transcendentals=0, bytes_accessed=bytes_accessed),
    )(x_fm, w1, b1, w2, b2, w3, b3, w4.T, b4)

    return out_fm[0, :B].reshape(B, 1)                               # back to [B, 1]


def init_params(key):
    """Deterministic init mimicking nn.Linear: w stored [out, in], b stored [out, 1]."""
    dims = [("input", 11, 16), ("fc1", 16, 32), ("fc2", 32, 32), ("output", 32, 1)]
    params = {}
    for name, fan_in, fan_out in dims:
        key, kw, kb = jax.random.split(key, 3)
        bound = 1.0 / (fan_in ** 0.5)  # PyTorch's default Linear init range
        w = jax.random.uniform(kw, (fan_out, fan_in), jnp.float32, -bound, bound)
        b = jax.random.uniform(kb, (fan_out, 1), jnp.float32, -bound, bound)
        params[name] = (w, b)
    return params


def winenet_reference(x, params):
    """Plain-JAX reference (matches F.linear: y = x @ W.T + b)."""
    h = x
    for name in ("input", "fc1", "fc2"):
        w, b = params[name]
        h = jnp.maximum(h @ w.T + b[:, 0], 0.0)
    w, b = params["output"]
    return h @ w.T + b[:, 0]


if __name__ == "__main__":
    key = jax.random.PRNGKey(0)
    key, kx = jax.random.split(key)
    batch = 8
    x = jax.random.normal(kx, (batch, 11), dtype=jnp.float32)

    params = init_params(key)

    out = winenet_forward(x, params)
    out = jax.block_until_ready(out)

    ref = winenet_reference(x, params)
    assert out.shape == (batch, 1), out.shape
    assert jnp.allclose(out, ref, atol=1e-5, rtol=1e-5), (out, ref)

    print("KERNEL_OK")
</pallas_src>

<mosaic_0001>
module attributes {stable_mosaic.version = 11 : i64} {
  func.func @winenet_kernel(%arg0: i32, %arg1: memref<11x128xf32, #tpu.memory_space<vmem>>, %arg2: memref<16x11xf32, #tpu.memory_space<vmem>>, %arg3: memref<16x1xf32, #tpu.memory_space<vmem>>, %arg4: memref<32x16xf32, #tpu.memory_space<vmem>>, %arg5: memref<32x1xf32, #tpu.memory_space<vmem>>, %arg6: memref<32x32xf32, #tpu.memory_space<vmem>>, %arg7: memref<32x1xf32, #tpu.memory_space<vmem>>, %arg8: memref<32x1xf32, #tpu.memory_space<vmem>>, %arg9: memref<1x1xf32, #tpu.memory_space<vmem>>, %arg10: memref<1x128xf32, #tpu.memory_space<vmem>>) attributes {dimension_semantics = [#tpu.dimension_semantics<parallel>], iteration_bounds = array<i64: 1>, scalar_prefetch = 0 : i64, scratch_operands = 0 : i64, tpu.core_type = #tpu.core_type<tc>, window_params = [{transform_indices = @transform_0, window_bounds = array<i64: 11, 128>}, {pipeline_mode = #tpu.pipeline_mode<synchronous>, transform_indices = @transform_1, window_bounds = array<i64: 16, 11>}, {pipeline_mode = #tpu.pipeline_mode<synchronous>, transform_indices = @transform_2, window_bounds = array<i64: 16, 1>}, {pipeline_mode = #tpu.pipeline_mode<synchronous>, transform_indices = @transform_3, window_bounds = array<i64: 32, 16>}, {pipeline_mode = #tpu.pipeline_mode<synchronous>, transform_indices = @transform_4, window_bounds = array<i64: 32, 1>}, {pipeline_mode = #tpu.pipeline_mode<synchronous>, transform_indices = @transform_5, window_bounds = array<i64: 32, 32>}, {pipeline_mode = #tpu.pipeline_mode<synchronous>, transform_indices = @transform_6, window_bounds = array<i64: 32, 1>}, {pipeline_mode = #tpu.pipeline_mode<synchronous>, transform_indices = @transform_7, window_bounds = array<i64: 32, 1>}, {pipeline_mode = #tpu.pipeline_mode<synchronous>, transform_indices = @transform_8, window_bounds = array<i64: 1, 1>}, {transform_indices = @transform_9, window_bounds = array<i64: 1, 128>}]} {
    %c0 = arith.constant 0 : index
    %c0_0 = arith.constant 0 : index
    %0 = vector.load %arg1[%c0, %c0_0] : memref<11x128xf32, #tpu.memory_space<vmem>>, vector<11x128xf32>
    %c0_1 = arith.constant 0 : index
    %c0_2 = arith.constant 0 : index
    %1 = vector.load %arg2[%c0_1, %c0_2] : memref<16x11xf32, #tpu.memory_space<vmem>>, vector<16x11xf32>
    %cst = arith.constant dense<0.000000e+00> : vector<16x128xf32>
    %2 = tpu.matmul %1, %0, %cst {dimension_numbers = #tpu.dot_dimension_numbers<[1], [0], [0], [1], [0, 0, 1, 1], [], []>} : vector<16x11xf32>, vector<11x128xf32>, vector<16x128xf32> -> vector<16x128xf32>
    %c0_3 = arith.constant 0 : index
    %c0_4 = arith.constant 0 : index
    %3 = vector.load %arg3[%c0_3, %c0_4] : memref<16x1xf32, #tpu.memory_space<vmem>>, vector<16x1xf32>
    %4 = vector.broadcast %3 : vector<16x1xf32> to vector<16x128xf32>
    %5 = arith.addf %2, %4 : vector<16x128xf32>
    %cst_5 = arith.constant 0.000000e+00 : f32
    %6 = vector.broadcast %cst_5 : f32 to vector<16x128xf32>
    %7 = arith.maximumf %5, %6 : vector<16x128xf32>
    %c0_6 = arith.constant 0 : index
    %c0_7 = arith.constant 0 : index
    %8 = vector.load %arg4[%c0_6, %c0_7] : memref<32x16xf32, #tpu.memory_space<vmem>>, vector<32x16xf32>
    %cst_8 = arith.constant dense<0.000000e+00> : vector<32x128xf32>
    %9 = tpu.matmul %8, %7, %cst_8 {dimension_numbers = #tpu.dot_dimension_numbers<[1], [0], [0], [1], [0, 0, 1, 1], [], []>} : vector<32x16xf32>, vector<16x128xf32>, vector<32x128xf32> -> vector<32x128xf32>
    %c0_9 = arith.constant 0 : index
    %c0_10 = arith.constant 0 : index
    %10 = vector.load %arg5[%c0_9, %c0_10] : memref<32x1xf32, #tpu.memory_space<vmem>>, vector<32x1xf32>
    %11 = vector.broadcast %10 : vector<32x1xf32> to vector<32x128xf32>
    %12 = arith.addf %9, %11 : vector<32x128xf32>
    %cst_11 = arith.constant 0.000000e+00 : f32
    %13 = vector.broadcast %cst_11 : f32 to vector<32x128xf32>
    %14 = arith.maximumf %12, %13 : vector<32x128xf32>
    %c0_12 = arith.constant 0 : index
    %c0_13 = arith.constant 0 : index
    %15 = vector.load %arg6[%c0_12, %c0_13] : memref<32x32xf32, #tpu.memory_space<vmem>>, vector<32x32xf32>
    %cst_14 = arith.constant dense<0.000000e+00> : vector<32x128xf32>
    %16 = tpu.matmul %15, %14, %cst_14 {dimension_numbers = #tpu.dot_dimension_numbers<[1], [0], [0], [1], [0, 0, 1, 1], [], []>} : vector<32x32xf32>, vector<32x128xf32>, vector<32x128xf32> -> vector<32x128xf32>
    %c0_15 = arith.constant 0 : index
    %c0_16 = arith.constant 0 : index
    %17 = vector.load %arg7[%c0_15, %c0_16] : memref<32x1xf32, #tpu.memory_space<vmem>>, vector<32x1xf32>
    %18 = vector.broadcast %17 : vector<32x1xf32> to vector<32x128xf32>
    %19 = arith.addf %16, %18 : vector<32x128xf32>
    %cst_17 = arith.constant 0.000000e+00 : f32
    %20 = vector.broadcast %cst_17 : f32 to vector<32x128xf32>
    %21 = arith.maximumf %19, %20 : vector<32x128xf32>
    %c0_18 = arith.constant 0 : index
    %c0_19 = arith.constant 0 : index
    %22 = vector.load %arg8[%c0_18, %c0_19] : memref<32x1xf32, #tpu.memory_space<vmem>>, vector<32x1xf32>
    %23 = vector.broadcast %22 : vector<32x1xf32> to vector<32x128xf32>
    %24 = arith.mulf %23, %21 : vector<32x128xf32>
    %cst_20 = arith.constant dense<0.000000e+00> : vector<128xf32>
    %25 = vector.multi_reduction <add>, %24, %cst_20 [0] : vector<32x128xf32> to vector<128xf32>
    %26 = vector.shape_cast %25 : vector<128xf32> to vector<1x128xf32>
    %c0_21 = arith.constant 0 : index
    %c0_22 = arith.constant 0 : index
    %27 = vector.load %arg9[%c0_21, %c0_22] : memref<1x1xf32, #tpu.memory_space<vmem>>, vector<1x1xf32>
    %28 = vector.broadcast %27 : vector<1x1xf32> to vector<1x128xf32>
    %29 = arith.addf %26, %28 : vector<1x128xf32>
    %c0_23 = arith.constant 0 : index
    %c0_24 = arith.constant 0 : index
    %30 = vector.load %arg10[%c0_23, %c0_24] : memref<1x128xf32, #tpu.memory_space<vmem>>, vector<1x128xf32>
    tpu.vector_store %arg10[%c0_23, %c0_24], %29 {strides = array<i32>} : memref<1x128xf32, #tpu.memory_space<vmem>>, vector<1x128xf32>,
    return
  }
  func.func @transform_0(%arg0: i32) -> (i32, i32) {
    %c0_i32 = arith.constant 0 : i32
    %c0_i32_0 = arith.constant 0 : i32
    return %c0_i32, %arg0 : i32, i32
  }
  func.func @transform_1(%arg0: i32) -> (i32, i32) {
    %c0_i32 = arith.constant 0 : i32
    %c0_i32_0 = arith.constant 0 : i32
    %c0_i32_1 = arith.constant 0 : i32
    return %c0_i32, %c0_i32_0 : i32, i32
  }
  func.func @transform_2(%arg0: i32) -> (i32, i32) {
    %c0_i32 = arith.constant 0 : i32
    %c0_i32_0 = arith.constant 0 : i32
    %c0_i32_1 = arith.constant 0 : i32
    return %c0_i32, %c0_i32_0 : i32, i32
  }
  func.func @transform_3(%arg0: i32) -> (i32, i32) {
    %c0_i32 = arith.constant 0 : i32
    %c0_i32_0 = arith.constant 0 : i32
    %c0_i32_1 = arith.constant 0 : i32
    return %c0_i32, %c0_i32_0 : i32, i32
  }
  func.func @transform_4(%arg0: i32) -> (i32, i32) {
    %c0_i32 = arith.constant 0 : i32
    %c0_i32_0 = arith.constant 0 : i32
    %c0_i32_1 = arith.constant 0 : i32
    return %c0_i32, %c0_i32_0 : i32, i32
  }
  func.func @transform_5(%arg0: i32) -> (i32, i32) {
    %c0_i32 = arith.constant 0 : i32
    %c0_i32_0 = arith.constant 0 : i32
    %c0_i32_1 = arith.constant 0 : i32
    return %c0_i32, %c0_i32_0 : i32, i32
  }
  func.func @transform_6(%arg0: i32) -> (i32, i32) {
    %c0_i32 = arith.constant 0 : i32
    %c0_i32_0 = arith.constant 0 : i32
    %c0_i32_1 = arith.constant 0 : i32
    return %c0_i32, %c0_i32_0 : i32, i32
  }
  func.func @transform_7(%arg0: i32) -> (i32, i32) {
    %c0_i32 = arith.constant 0 : i32
    %c0_i32_0 = arith.constant 0 : i32
    %c0_i32_1 = arith.constant 0 : i32
    return %c0_i32, %c0_i32_0 : i32, i32
  }
  func.func @transform_8(%arg0: i32) -> (i32, i32) {
    %c0_i32 = arith.constant 0 : i32
    %c0_i32_0 = arith.constant 0 : i32
    %c0_i32_1 = arith.constant 0 : i32
    return %c0_i32, %c0_i32_0 : i32, i32
  }
  func.func @transform_9(%arg0: i32) -> (i32, i32) {
    %c0_i32 = arith.constant 0 : i32
    %c0_i32_0 = arith.constant 0 : i32
    return %c0_i32, %arg0 : i32, i32
  }
}

</mosaic_0001>

<bundles_post_ra>
// kernel: tpu_custom_call.1
= control target key start
LH: loop header
LB: loop body
LE: loop exit
PB: predicated region body
PF: predicated region fallthrough
CT: control target
= control target key end

     0   :  { %s481_s0 = inlined_call_operand.vmem [shape: f32[11,128], index: 0, kind: input, shape index: {}]   ;;  %s482_s1 = inlined_call_operand.vmem [shape: f32[16,11], index: 1, kind: input, shape index: {}]   ;;  %s483_s2 = inlined_call_operand.vmem [shape: f32[16,1], index: 2, kind: input, shape index: {}]   ;;  %s484_s3 = inlined_call_operand.vmem [shape: f32[32,16], index: 3, kind: input, shape index: {}]   ;;  %s485_s4 = inlined_call_operand.vmem [shape: f32[32,1], index: 4, kind: input, shape index: {}]   ;;  %s486_s5 = inlined_call_operand.vmem [shape: f32[32,32], index: 5, kind: input, shape index: {}]   ;;  %s487_s6 = inlined_call_operand.vmem [shape: f32[32,1], index: 6, kind: input, shape index: {}]   ;;  %s488_s7 = inlined_call_operand.vmem [shape: f32[32,1], index: 7, kind: input, shape index: {}]   ;;  %s489_s8 = inlined_call_operand.<no memory space> [shape: f32[1,1], index: 8, kind: input, shape index: {}]   ;;  %s490_s9 = inlined_call_operand.hbm [shape: f32[1,128], index: 9, kind: output, shape index: {}]  }
   0x1   :  { %v14_v0 = vstv %s489_s8 }
   0x2   :  { %15 = vst [vmem:[#allocation2] sm:$0x1] %v14_v0 }
   0x3   :  { %v36_v1 = vld [vmem:[%s481_s0 + $0x8] sm:$0x7]  ;;  %vm58_vm0 = vcmask 1042432   ;;  %v35_v3 = vld [vmem:[%s481_s0] sm:$0xff]  ;;  %v345_v4 = vmov 0   ;;  %vm51_vm1 = vcmask 89088  }
   0x4   :  { %v40_v2 = vld [vmem:[%s483_s2 + $0x8] sm:$0xff]  ;;  %316 = vset.pattern.permute.xlu0 %v345_v4  ;;  %297 = vmatpush.msk.msra.mxu0 %vm58_vm0, %v36_v1  ;;  %v37_v5 = vld [vmem:[%s482_s1] sm:$0xff] }
   0x5   :  { %48 = vperm.xlu0 %316, %v40_v2   ;;  %317 = vset.pattern.permute.xlu1 %v345_v4 }
   0x6   :  { %77 = vmatpush.msra.mxu0 %v35_v3  ;;  %318 = vset.pattern.permute.xlu2 %v345_v4 }
   0x7   :  { %16 = vsyncpa [#allocation4], 0  ;;  %298 = vmatmul.msk.f32.vlgmr.msra.gmra.mxu0 %vm51_vm1, %v37_v5  ;;  %v39_v6 = vld [vmem:[%s483_s2] sm:$0xff]  ;;  %v38_v7 = vld [vmem:[%s482_s1 + $0x8] sm:$0xff]  ;;  %vm115_vm2 = vcmask 130048   ;;  %vm189_vm3 = vcmask 261120  }
   0x8   :  { %v165_v8 = vld [vmem:[%s487_s6] sm:$0xff]  ;;  %v168_v9 = vld [vmem:[%s487_s6 + $0x18] sm:$0xff]  ;;  %v237_v10 = vld [vmem:[%s488_s7 + $0x10] sm:$0xff]  ;;  %s288_s12 = sshll.u32 %s490_s9, 4  ;;  %s289_s12 = int_to_ptr.hbm [resolvable:$true] %s288_s12 }
   0x9   :  { %v94_v11 = vld [vmem:[%s485_s4 + $0x18] sm:$0xff]  ;;  %v93_v12 = vld [vmem:[%s485_s4 + $0x10] sm:$0xff]  ;;  %v166_v13 = vld [vmem:[%s487_s6 + $0x8] sm:$0xff] }
   0xa   :  { %112 = vperm.xlu1 %317, %v94_v11   ;;  %v235_v14 = vld [vmem:[%s488_s7] sm:$0xff]  ;;  %v92_v15 = vld [vmem:[%s485_s4 + $0x8] sm:$0xff]  ;;  %v238_v18 = vld [vmem:[%s488_s7 + $0x18] sm:$0xff] }
   0xb   :  { %102 = vperm.xlu2 %318, %v92_v15   ;;  %v91_v19 = vld [vmem:[%s485_s4] sm:$0xff]  ;;  %v167_v20 = vld [vmem:[%s487_s6 + $0x10] sm:$0xff]  ;;  %v90_v28 = vld [vmem:[%s484_s3 + $0x18] sm:$0xff] }
   0xc   :  { %v87_v27 = vld [vmem:[%s484_s3] sm:$0xff]  ;;  %v236_v29 = vld [vmem:[%s488_s7 + $0x8] sm:$0xff]  ;;  %v89_v32 = vld [vmem:[%s484_s3 + $0x10] sm:$0xff] }
   0xd   :  { %43 = vperm.xlu0 %316, %v39_v6   ;;  %v88_v30 = vld [vmem:[%s484_s3 + $0x8] sm:$0xff]  ;;  %v272_v31 = vld [vmem:[#allocation2] sm:$0x1]  ;;  %v163_v51 = vld [vmem:[%s486_s5 + $0x10] sm:$0xff] }
   0xe   :  { %v161_v49 = vld [vmem:[%s486_s5] sm:$0xff]  ;;  %v162_v50 = vld [vmem:[%s486_s5 + $0x8] sm:$0xff]  ;;  %v164_v52 = vld [vmem:[%s486_s5 + $0x18] sm:$0xff]  ;;  %s346_s5 = smov [#allocation3]  }
   0xf   :  { %299 = vmatmul.msk.f32.gmra.mxu0 %vm51_vm1, %v38_v7  ;;  %s286_s30 = sshll.u32 %s346_s5, 4  ;;  %s287_s30 = int_to_ptr.vmem [resolvable:$true] %s286_s30 }
  0x12   :  { %107 = vperm.xlu1 %317, %v93_v12  }
  0x13   :  { %97 = vperm.xlu2 %318, %v91_v19  }
  0x15   :  { %171 = vperm.xlu0 %316, %v165_v8  }
  0x1a   :  { %176 = vperm.xlu1 %317, %v166_v13  }
  0x1b   :  { %181 = vperm.xlu2 %318, %v167_v20  }
  0x1d   :  { %186 = vperm.xlu0 %316, %v168_v9  }
  0x22   :  { %241 = vperm.xlu1 %317, %v235_v14  }
  0x23   :  { %246 = vperm.xlu2 %318, %v236_v29  }
  0x25   :  { %251 = vperm.xlu0 %316, %v237_v10  }
  0x2a   :  { %256 = vperm.xlu1 %317, %v238_v18  }
  0x2b   :  { %275 = vperm.xlu2 %318, %v272_v31  }
  0x65   :  { %v103_v37 = vpop.permute.xlu2 %102 }
  0x6d   :  { %v98_v44 = vpop.permute.xlu2 %97 }
  0x75   :  { %v182_v56 = vpop.permute.xlu2 %181 }
  0x77   :  { %v49_v16 = vpop.permute.xlu0 %48 }
  0x7c   :  { %v113_v34 = vpop.permute.xlu1 %112 }
  0x7d   :  { %v247_v3 = vpop.permute.xlu2 %246 }
  0x7f   :  { %v44_v21 = vpop.permute.xlu0 %43 }
  0x84   :  { %v79_v17 = vpop.f32.mrf.mxu0  ;;  %v108_v40 = vpop.permute.xlu1 %107 }
  0x85   :  { %v80_v23 = vadd.f32 %v79_v17, %v44_v21  ;;  %v276_v20 = vpop.permute.xlu2 %275 }
  0x87   :  { %v85_v26 = vmax.f32 %v80_v23, 0.0  ;;  %v172_v53 = vpop.permute.xlu0 %171 }
  0x8c   :  { %v82_v22 = vpop.f32.mrf.mxu0  ;;  %v177_v54 = vpop.permute.xlu1 %176 }
  0x8d   :  { %v83_v24 = vadd.f32 %v82_v22, %v49_v16  ;;  %v278_v22 = vperm.slane %v276_v20, 0 }
  0x8f   :  { %v86_v25 = vmax.f32 %v83_v24, 0.0  ;;  %v187_v58 = vpop.permute.xlu0 %186 }
  0x91   :  { %142 = vmatpush.msra.mxu1 %v86_v25  ;;  %308 = vmatpush.msra.mxu2 %v86_v25 }
  0x93   :  { %143 = vmatpush.msra.mxu1 %v85_v26  ;;  %309 = vmatpush.msra.mxu2 %v85_v26 }
  0x94   :  { %300 = vmatmul.msk.f32.vlgmr.msra.gmra.mxu1 %vm115_vm2, %v87_v27  ;;  %303 = vmatmul.msk.f32.vlgmr.msra.gmra.mxu2 %vm115_vm2, %v90_v28  ;;  %v242_v63 = vpop.permute.xlu1 %241 }
  0x97   :  { %v252_v6 = vpop.permute.xlu0 %251 }
  0x9c   :  { %301 = vmatmul.msk.f32.gmra.mxu1 %vm115_vm2, %v88_v30  ;;  %v257_v12 = vpop.permute.xlu1 %256 }
  0xa4   :  { %302 = vmatmul.msk.f32.gmra.mxu1 %vm115_vm2, %v89_v32 }
 0x111   :  { %v145_v33 = vpop.f32.mrf.mxu1 }
 0x112   :  { %v146_v45 = vadd.f32 %v145_v33, %v98_v44 }
 0x114   :  { %v157_v48 = vmax.f32 %v146_v45, 0.0 }
 0x117   :  { %v154_v35 = vpop.f32.mrf.mxu2 }
 0x118   :  { %v155_v36 = vadd.f32 %v154_v35, %v113_v34 }
 0x119   :  { %v148_v38 = vpop.f32.mrf.mxu1 }
 0x11a   :  { %v160_v39 = vmax.f32 %v155_v36, 0.0  ;;  %v149_v42 = vadd.f32 %v148_v38, %v103_v37 }
 0x11c   :  { %214 = vmatpush.msrb.mxu2 %v160_v39  ;;  %310 = vmatpush.msra.mxu3 %v160_v39  ;;  %v158_v47 = vmax.f32 %v149_v42, 0.0 }
 0x121   :  { %v151_v41 = vpop.f32.mrf.mxu1 }
 0x122   :  { %v152_v43 = vadd.f32 %v151_v41, %v108_v40 }
 0x124   :  { %v159_v46 = vmax.f32 %v152_v43, 0.0 }
 0x126   :  { %215 = vmatpush.msrb.mxu2 %v159_v46  ;;  %311 = vmatpush.msra.mxu3 %v159_v46 }
 0x128   :  { %216 = vmatpush.msrb.mxu2 %v158_v47  ;;  %312 = vmatpush.msra.mxu3 %v158_v47 }
 0x12a   :  { %217 = vmatpush.msrb.mxu2 %v157_v48  ;;  %313 = vmatpush.msra.mxu3 %v157_v48 }
 0x12b   :  { %304 = vmatmul.msk.f32.vlgmr.msrb.gmra.mxu2 %vm189_vm3, %v161_v49  ;;  %305 = vmatmul.msk.f32.vlgmr.msra.gmra.mxu3 %vm189_vm3, %v162_v50 }
 0x133   :  { %306 = vmatmul.msk.f32.gmra.mxu3 %vm189_vm3, %v163_v51 }
 0x13b   :  { %307 = vmatmul.msk.f32.gmra.mxu3 %vm189_vm3, %v164_v52 }
 0x1ae   :  { %v222_v55 = vpop.f32.mrf.mxu3  ;;  %v219_v57 = vpop.f32.mrf.mxu2 }
 0x1af   :  { %v220_v59 = vadd.f32 %v219_v57, %v172_v53  ;;  %v223_v60 = vadd.f32 %v222_v55, %v177_v54 }
 0x1b1   :  { %v231_v0 = vmax.f32 %v220_v59, 0.0  ;;  %v232_v1 = vmax.f32 %v223_v60, 0.0 }
 0x1b3   :  { %v259_v4 = vmul.f32 %v242_v63, %v231_v0  ;;  %v260_v5 = vmul.f32 %v247_v3, %v232_v1 }
 0x1b5   :  { %v263_v10 = vadd.f32 %v260_v5, %v259_v4 }
 0x1b6   :  { %v225_v61 = vpop.f32.mrf.mxu3 }
 0x1b7   :  { %v226_v62 = vadd.f32 %v225_v61, %v182_v56 }
 0x1b9   :  { %v233_v2 = vmax.f32 %v226_v62, 0.0 }
 0x1bb   :  { %v261_v8 = vmul.f32 %v252_v6, %v233_v2 }
 0x1bd   :  { %v264_v13 = vadd.f32 %v263_v10, %v261_v8 }
 0x1be   :  { %v228_v7 = vpop.f32.mrf.mxu3 }
 0x1bf   :  { %v229_v9 = vadd.f32 %v228_v7, %v187_v58 }
 0x1c1   :  { %v234_v11 = vmax.f32 %v229_v9, 0.0 }
 0x1c3   :  { %v262_v14 = vmul.f32 %v257_v12, %v234_v11 }
 0x1c5   :  { %v265_v15 = vadd.f32 %v264_v13, %v262_v14 }
 0x1c7   :  { %v266_v16 = vrot.slane %v265_v15, 4 }
 0x1c9   :  { %v267_v17 = vadd.f32 %v266_v16, %v265_v15 }
 0x1cb   :  { %v268_v18 = vrot.slane %v267_v17, 2 }
 0x1cd   :  { %v269_v19 = vadd.f32 %v268_v18, %v267_v17 }
 0x1cf   :  { %v270_v21 = vrot.slane %v269_v19, 1 }
 0x1d1   :  { %v271_v23 = vadd.f32 %v270_v21, %v269_v19 }
 0x1d3   :  { %v279_v24 = vadd.f32 %v278_v22, %v271_v23 }
 0x1d5   :  { %280 = vst [vmem:[#allocation3] sm:$0x1] %v279_v24 }
 0x1d6   :  { %291 = dma.vmem_to_hbm [thread:$0]  %s287_s30, 16, %s289_s12, [#allocation4]  }
 0x1d7   :  { %343 = dma.done.wait [#allocation4], 16  }
 0x1d8   :  { %344 = vsyncadd [#allocation4], 4294967280 }
 0x1d9   :  { %296 = vsyncpa [#allocation4], 1 }

</bundles_post_ra>
